<compile_context>
chip_gen: v7x
topology: tpu7x:2x2x1
jax: 0.10.0
libtpu: 0.0.40
codegen_flags: <defaults>
</compile_context>

<pallas_src>
import jax
import jax.numpy as jnp
from jax.experimental import pallas as pl
from jax.experimental.pallas import tpu as pltpu


def _round_up(x, m):
    return (x + m - 1) // m * m


# ---------------------------------------------------------------------------
# Kernel
# ---------------------------------------------------------------------------
def discriminator_kernel(z_ref, w1_ref, b1_ref, w2_ref, b2_ref, w3_ref, b3_ref, out_ref):
    # Layer 1: Linear + ReLU  (bf16 MXU inputs, fp32 accumulate)
    h1 = jnp.dot(z_ref[...], w1_ref[...], preferred_element_type=jnp.float32) + b1_ref[...]
    h1 = jnp.maximum(h1, 0.0)

    # Layer 2: Linear + ReLU
    h2 = jnp.dot(h1.astype(jnp.bfloat16), w2_ref[...],
                 preferred_element_type=jnp.float32) + b2_ref[...]
    h2 = jnp.maximum(h2, 0.0)

    # Layer 3: Linear (class dim padded to 128 lanes; padded cols carry -1e30 bias)
    logits = jnp.dot(h2.astype(jnp.bfloat16), w3_ref[...],
                     preferred_element_type=jnp.float32) + b3_ref[...]

    # Softmax over the (padded) class dimension.  Padded columns: exp(-1e30 - m) == 0,
    # so they contribute nothing to the denominator and the real columns match
    # nn.Softmax over n_classes exactly.  Exact divide -> rows sum to 1 to fp32 eps.
    m = jnp.max(logits, axis=-1, keepdims=True)
    e = jnp.exp(logits - m)
    denom = jnp.sum(e, axis=-1, keepdims=True)
    out_ref[...] = (e / denom).astype(out_ref.dtype)


# ---------------------------------------------------------------------------
# Wrapper
# ---------------------------------------------------------------------------
def _resident_spec(a):
    """Constant-index, single-buffered BlockSpec: DMA'd once, stays in VMEM."""
    idx_map = lambda i: (0,) * a.ndim
    if hasattr(pl, "Buffered"):
        return pl.BlockSpec(a.shape, idx_map, pipeline_mode=pl.Buffered(1))
    return pl.BlockSpec(a.shape, idx_map)


def discriminator_forward(z, kernel_params, n_classes, tb=None):
    w1, b1, w2, b2, w3, b3 = kernel_params
    B, z_dim = z.shape
    hidden = w1.shape[1]
    N_PAD = w3.shape[1]

    # Batch tile: multiple of 8 sublanes, capped at 512 (fits the v5e 16 MiB scoped
    # VMEM default with headroom); aim for >=2 grid steps when B > 8 so the
    # "parallel" axis shards across the 2 TensorCores on v7x.
    if tb is None:
        tb = min(512, _round_up(max((B + 1) // 2, 8), 8))
    Bp = _round_up(B, tb)

    # Ship z unpadded in K, cast to bf16 in the wrapper (cuts input DMA traffic);
    # only pad the batch axis up to a tile multiple.
    zb = z.astype(jnp.bfloat16)
    if Bp != B:
        zb = jnp.zeros((Bp, z_dim), jnp.bfloat16).at[:B].set(zb)

    weight_bytes = sum(int(a.size) * a.dtype.itemsize for a in (w1, b1, w2, b2, w3, b3))
    act_bytes = tb * (
        2 * z_dim * 2        # z double buffer (bf16)
        + 2 * N_PAD * 4      # out double buffer (f32)
        + 2 * hidden * 4     # h1 / h2 fp32 temporaries
        + 2 * hidden * 2     # bf16 casts of h1 / h2
        + 3 * N_PAD * 4      # logits / exp / softmax temporaries
    )
    # 2x on weights in case single-buffering is unavailable, plus ~50% slack.
    vmem_limit = int(1.5 * (2 * weight_bytes + act_bytes))
    vmem_limit = max(8 << 20, min(64 << 20, vmem_limit))

    flops = 2 * Bp * (z_dim * hidden + hidden * hidden + hidden * N_PAD)
    bytes_accessed = zb.size * 2 + weight_bytes + Bp * N_PAD * 4

    out = pl.pallas_call(
        discriminator_kernel,
        out_shape=jax.ShapeDtypeStruct((Bp, N_PAD), jnp.float32),
        grid=(Bp // tb,),
        in_specs=[
            pl.BlockSpec((tb, z_dim), lambda i: (i, 0)),   # z: tiled over batch
            _resident_spec(w1), _resident_spec(b1),
            _resident_spec(w2), _resident_spec(b2),
            _resident_spec(w3), _resident_spec(b3),
        ],
        out_specs=pl.BlockSpec((tb, N_PAD), lambda i: (i, 0)),
        compiler_params=pltpu.CompilerParams(
            dimension_semantics=("parallel",),
            vmem_limit_bytes=vmem_limit,
        ),
        cost_estimate=pl.CostEstimate(
            flops=int(flops),
            transcendentals=int(Bp * N_PAD),
            bytes_accessed=int(bytes_accessed),
        ),
    )(zb, w1, b1, w2, b2, w3, b3)

    # Strip batch / class padding.
    return out[:B, :n_classes]


# ---------------------------------------------------------------------------
# Parameter construction (matches PyTorch kaiming_normal_, zero bias)
# ---------------------------------------------------------------------------
def make_params(key, z_dim=32, hidden=512, n_classes=1):
    k1, k2, k3 = jax.random.split(key, 3)

    def kaiming(k, fan_in, fan_out):
        # kaiming_normal (fan_in mode, a=0): std = sqrt(2 / fan_in).
        std = (2.0 / fan_in) ** 0.5
        return std * jax.random.normal(k, (fan_in, fan_out), jnp.float32)

    N_PAD = _round_up(max(n_classes, 1), 128)

    # fp32 reference weights, (in, out) layout.
    w1f = kaiming(k1, z_dim, hidden)
    w2f = kaiming(k2, hidden, hidden)
    w3f = kaiming(k3, hidden, n_classes)
    b1f = jnp.zeros((1, hidden), jnp.float32)
    b2f = jnp.zeros((1, hidden), jnp.float32)
    b3f = jnp.zeros((1, n_classes), jnp.float32)
    ref_params = (w1f, b1f, w2f, b2f, w3f, b3f)

    # Kernel params: weights bf16 (z_dim unpadded, class dim lane-padded), biases fp32.
    w1 = w1f.astype(jnp.bfloat16)
    w2 = w2f.astype(jnp.bfloat16)
    w3 = jnp.zeros((hidden, N_PAD), jnp.float32).at[:, :n_classes].set(w3f).astype(jnp.bfloat16)
    # Padded class columns get a huge negative bias -> softmax weight exactly 0.
    b3 = jnp.full((1, N_PAD), -1e30, jnp.float32).at[:, :n_classes].set(b3f)
    kernel_params = (w1, b1f, w2, b2f, w3, b3)

    return kernel_params, ref_params


# ---------------------------------------------------------------------------
# References
# ---------------------------------------------------------------------------
def reference_forward_fp32(z, ref_params):
    """Pure fp32 reference matching the PyTorch module semantics."""
    w1, b1, w2, b2, w3, b3 = ref_params
    h1 = jnp.maximum(z @ w1 + b1, 0.0)
    h2 = jnp.maximum(h1 @ w2 + b2, 0.0)
    return jax.nn.softmax(h2 @ w3 + b3, axis=-1)


def reference_forward_bf16(z, kernel_params, n_classes):
    """Structural reference: same bf16 casts / padding as the kernel."""
    w1, b1, w2, b2, w3, b3 = kernel_params
    zb = z.astype(jnp.bfloat16)
    h1 = jnp.maximum(jnp.dot(zb, w1, preferred_element_type=jnp.float32) + b1, 0.0)
    h2 = jnp.maximum(jnp.dot(h1.astype(jnp.bfloat16), w2,
                             preferred_element_type=jnp.float32) + b2, 0.0)
    logits = jnp.dot(h2.astype(jnp.bfloat16), w3,
                     preferred_element_type=jnp.float32) + b3
    return jax.nn.softmax(logits, axis=-1)[:, :n_classes]


# ---------------------------------------------------------------------------
if __name__ == "__main__":
    key = jax.random.PRNGKey(0)

    # --- Case 1: module defaults (z_dim=32, n_classes=1, small batch) -------
    # Note: with n_classes=1 the softmax output is identically 1.0; this matches
    # PyTorch nn.Softmax on a (B, 1) tensor (faithful, even if it is likely a
    # modeling bug in the original code).
    z_dim, n_classes, batch = 32, 1, 8
    kz, kp = jax.random.split(key)
    z = jax.random.normal(kz, (batch, z_dim), jnp.float32)
    kparams, rparams = make_params(kp, z_dim=z_dim, hidden=512, n_classes=n_classes)

    out = jax.block_until_ready(discriminator_forward(z, kparams, n_classes))
    assert out.shape == (batch, n_classes)
    assert jnp.allclose(out, jnp.ones((batch, n_classes), jnp.float32), atol=1e-5)

    # --- Case 2: non-trivial class count to exercise the softmax path -------
    z_dim2, n_classes2, batch2 = 32, 10, 16
    kz2, kp2 = jax.random.split(jax.random.PRNGKey(1))
    z2 = jax.random.normal(kz2, (batch2, z_dim2), jnp.float32)
    kparams2, rparams2 = make_params(kp2, z_dim=z_dim2, hidden=512, n_classes=n_classes2)

    out2 = jax.block_until_ready(discriminator_forward(z2, kparams2, n_classes2))
    assert out2.shape == (batch2, n_classes2)

    # Structural check (same bf16 casts as kernel): tight tolerance.
    ref_bf16 = reference_forward_bf16(z2, kparams2, n_classes2)
    assert jnp.allclose(out2, ref_bf16, atol=2e-3, rtol=2e-3)

    # Semantic check vs. pure fp32 module math: loose tolerance (bf16 MXU inputs).
    ref_f32 = reference_forward_fp32(z2, rparams2)
    assert jnp.allclose(out2, ref_f32, atol=5e-2, rtol=5e-2)
    # Row sums of a softmax are 1 (exact divide in the kernel).
    assert jnp.allclose(jnp.sum(out2, axis=-1), jnp.ones((batch2,)), atol=1e-3)

    print("KERNEL_OK")
</pallas_src>

<mosaic_0001>
module attributes {stable_mosaic.version = 11 : i64} {
  func.func @discriminator_kernel(%arg0: i32, %arg1: memref<8x32xbf16, #tpu.memory_space<vmem>>, %arg2: memref<32x512xbf16, #tpu.memory_space<vmem>>, %arg3: memref<1x512xf32, #tpu.memory_space<vmem>>, %arg4: memref<512x512xbf16, #tpu.memory_space<vmem>>, %arg5: memref<1x512xf32, #tpu.memory_space<vmem>>, %arg6: memref<512x128xbf16, #tpu.memory_space<vmem>>, %arg7: memref<1x128xf32, #tpu.memory_space<vmem>>, %arg8: memref<8x128xf32, #tpu.memory_space<vmem>>) attributes {dimension_semantics = [#tpu.dimension_semantics<parallel>], iteration_bounds = array<i64: 1>, scalar_prefetch = 0 : i64, scratch_operands = 0 : i64, tpu.core_type = #tpu.core_type<tc>, window_params = [{transform_indices = @transform_0, window_bounds = array<i64: 8, 32>}, {pipeline_mode = #tpu.pipeline_mode<synchronous>, transform_indices = @transform_1, window_bounds = array<i64: 32, 512>}, {pipeline_mode = #tpu.pipeline_mode<synchronous>, transform_indices = @transform_2, window_bounds = array<i64: 1, 512>}, {pipeline_mode = #tpu.pipeline_mode<synchronous>, transform_indices = @transform_3, window_bounds = array<i64: 512, 512>}, {pipeline_mode = #tpu.pipeline_mode<synchronous>, transform_indices = @transform_4, window_bounds = array<i64: 1, 512>}, {pipeline_mode = #tpu.pipeline_mode<synchronous>, transform_indices = @transform_5, window_bounds = array<i64: 512, 128>}, {pipeline_mode = #tpu.pipeline_mode<synchronous>, transform_indices = @transform_6, window_bounds = array<i64: 1, 128>}, {transform_indices = @transform_7, window_bounds = array<i64: 8, 128>}]} {
    %c0 = arith.constant 0 : index
    %c0_0 = arith.constant 0 : index
    %0 = vector.load %arg1[%c0, %c0_0] : memref<8x32xbf16, #tpu.memory_space<vmem>>, vector<8x32xbf16>
    %c0_1 = arith.constant 0 : index
    %c0_2 = arith.constant 0 : index
    %1 = vector.load %arg2[%c0_1, %c0_2] : memref<32x512xbf16, #tpu.memory_space<vmem>>, vector<32x512xbf16>
    %cst = arith.constant dense<0.000000e+00> : vector<8x512xf32>
    %2 = tpu.matmul %0, %1, %cst {dimension_numbers = #tpu.dot_dimension_numbers<[1], [0], [0], [1], [0, 0, 1, 1], [], []>} : vector<8x32xbf16>, vector<32x512xbf16>, vector<8x512xf32> -> vector<8x512xf32>
    %c0_3 = arith.constant 0 : index
    %c0_4 = arith.constant 0 : index
    %3 = vector.load %arg3[%c0_3, %c0_4] : memref<1x512xf32, #tpu.memory_space<vmem>>, vector<1x512xf32>
    %4 = vector.broadcast %3 : vector<1x512xf32> to vector<8x512xf32>
    %5 = arith.addf %2, %4 : vector<8x512xf32>
    %cst_5 = arith.constant 0.000000e+00 : f32
    %6 = vector.broadcast %cst_5 : f32 to vector<8x512xf32>
    %7 = arith.maximumf %5, %6 : vector<8x512xf32>
    %8 = arith.truncf %7 : vector<8x512xf32> to vector<8x512xbf16>
    %c0_6 = arith.constant 0 : index
    %c0_7 = arith.constant 0 : index
    %9 = vector.load %arg4[%c0_6, %c0_7] : memref<512x512xbf16, #tpu.memory_space<vmem>>, vector<512x512xbf16>
    %cst_8 = arith.constant dense<0.000000e+00> : vector<8x512xf32>
    %10 = tpu.matmul %8, %9, %cst_8 {dimension_numbers = #tpu.dot_dimension_numbers<[1], [0], [0], [1], [0, 0, 1, 1], [], []>} : vector<8x512xbf16>, vector<512x512xbf16>, vector<8x512xf32> -> vector<8x512xf32>
    %c0_9 = arith.constant 0 : index
    %c0_10 = arith.constant 0 : index
    %11 = vector.load %arg5[%c0_9, %c0_10] : memref<1x512xf32, #tpu.memory_space<vmem>>, vector<1x512xf32>
    %12 = vector.broadcast %11 : vector<1x512xf32> to vector<8x512xf32>
    %13 = arith.addf %10, %12 : vector<8x512xf32>
    %cst_11 = arith.constant 0.000000e+00 : f32
    %14 = vector.broadcast %cst_11 : f32 to vector<8x512xf32>
    %15 = arith.maximumf %13, %14 : vector<8x512xf32>
    %16 = arith.truncf %15 : vector<8x512xf32> to vector<8x512xbf16>
    %c0_12 = arith.constant 0 : index
    %c0_13 = arith.constant 0 : index
    %17 = vector.load %arg6[%c0_12, %c0_13] : memref<512x128xbf16, #tpu.memory_space<vmem>>, vector<512x128xbf16>
    %cst_14 = arith.constant dense<0.000000e+00> : vector<8x128xf32>
    %18 = tpu.matmul %16, %17, %cst_14 {dimension_numbers = #tpu.dot_dimension_numbers<[1], [0], [0], [1], [0, 0, 1, 1], [], []>} : vector<8x512xbf16>, vector<512x128xbf16>, vector<8x128xf32> -> vector<8x128xf32>
    %c0_15 = arith.constant 0 : index
    %c0_16 = arith.constant 0 : index
    %19 = vector.load %arg7[%c0_15, %c0_16] : memref<1x128xf32, #tpu.memory_space<vmem>>, vector<1x128xf32>
    %20 = vector.broadcast %19 : vector<1x128xf32> to vector<8x128xf32>
    %21 = arith.addf %18, %20 : vector<8x128xf32>
    %cst_17 = arith.constant dense<0xFF800000> : vector<8xf32>
    %22 = vector.multi_reduction <maximumf>, %21, %cst_17 [1] : vector<8x128xf32> to vector<8xf32>
    %23 = vector.shape_cast %22 : vector<8xf32> to vector<8x1xf32>
    %24 = vector.broadcast %23 : vector<8x1xf32> to vector<8x128xf32>
    %25 = arith.subf %21, %24 : vector<8x128xf32>
    %26 = math.exp %25 : vector<8x128xf32>
    %cst_18 = arith.constant dense<0.000000e+00> : vector<8xf32>
    %27 = vector.multi_reduction <add>, %26, %cst_18 [1] : vector<8x128xf32> to vector<8xf32>
    %28 = vector.shape_cast %27 : vector<8xf32> to vector<8x1xf32>
    %29 = vector.broadcast %28 : vector<8x1xf32> to vector<8x128xf32>
    %30 = arith.divf %26, %29 : vector<8x128xf32>
    %c0_19 = arith.constant 0 : index
    %c0_20 = arith.constant 0 : index
    %31 = vector.load %arg8[%c0_19, %c0_20] : memref<8x128xf32, #tpu.memory_space<vmem>>, vector<8x128xf32>
    tpu.vector_store %arg8[%c0_19, %c0_20], %30 {strides = array<i32>} : memref<8x128xf32, #tpu.memory_space<vmem>>, vector<8x128xf32>,
    return
  }
  func.func @transform_0(%arg0: i32) -> (i32, i32) {
    %c0_i32 = arith.constant 0 : i32
    %c0_i32_0 = arith.constant 0 : i32
    return %arg0, %c0_i32 : i32, i32
  }
  func.func @transform_1(%arg0: i32) -> (i32, i32) {
    %c0_i32 = arith.constant 0 : i32
    %c0_i32_0 = arith.constant 0 : i32
    %c0_i32_1 = arith.constant 0 : i32
    return %c0_i32, %c0_i32_0 : i32, i32
  }
  func.func @transform_2(%arg0: i32) -> (i32, i32) {
    %c0_i32 = arith.constant 0 : i32
    %c0_i32_0 = arith.constant 0 : i32
    %c0_i32_1 = arith.constant 0 : i32
    return %c0_i32, %c0_i32_0 : i32, i32
  }
  func.func @transform_3(%arg0: i32) -> (i32, i32) {
    %c0_i32 = arith.constant 0 : i32
    %c0_i32_0 = arith.constant 0 : i32
    %c0_i32_1 = arith.constant 0 : i32
    return %c0_i32, %c0_i32_0 : i32, i32
  }
  func.func @transform_4(%arg0: i32) -> (i32, i32) {
    %c0_i32 = arith.constant 0 : i32
    %c0_i32_0 = arith.constant 0 : i32
    %c0_i32_1 = arith.constant 0 : i32
    return %c0_i32, %c0_i32_0 : i32, i32
  }
  func.func @transform_5(%arg0: i32) -> (i32, i32) {
    %c0_i32 = arith.constant 0 : i32
    %c0_i32_0 = arith.constant 0 : i32
    %c0_i32_1 = arith.constant 0 : i32
    return %c0_i32, %c0_i32_0 : i32, i32
  }
  func.func @transform_6(%arg0: i32) -> (i32, i32) {
    %c0_i32 = arith.constant 0 : i32
    %c0_i32_0 = arith.constant 0 : i32
    %c0_i32_1 = arith.constant 0 : i32
    return %c0_i32, %c0_i32_0 : i32, i32
  }
  func.func @transform_7(%arg0: i32) -> (i32, i32) {
    %c0_i32 = arith.constant 0 : i32
    %c0_i32_0 = arith.constant 0 : i32
    return %arg0, %c0_i32 : i32, i32
  }
}

</mosaic_0001>

<bundles_post_ra>
// kernel: tpu_custom_call.1
= control target key start
LH: loop header
LB: loop body
LE: loop exit
PB: predicated region body
PF: predicated region fallthrough
CT: control target
= control target key end

     0   :  { %12 = vsyncpa [#allocation3], 0  ;;  %s2329_s0 = inlined_call_operand.hbm [shape: bf16[8,32], index: 0, kind: input, shape index: {}]   ;;  %s2330_s1 = inlined_call_operand.hbm [shape: bf16[32,512], index: 1, kind: input, shape index: {}]   ;;  %s2331_s2 = inlined_call_operand.vmem [shape: f32[1,512], index: 2, kind: input, shape index: {}]   ;;  %s2332_s3 = inlined_call_operand.hbm [shape: bf16[512,512], index: 3, kind: input, shape index: {}]   ;;  %s2333_s4 = inlined_call_operand.vmem [shape: f32[1,512], index: 4, kind: input, shape index: {}]   ;;  %s2334_s5 = inlined_call_operand.hbm [shape: bf16[512,128], index: 5, kind: input, shape index: {}]   ;;  %s2335_s6 = inlined_call_operand.vmem [shape: f32[1,128], index: 6, kind: input, shape index: {}]   ;;  %s2336_s7 = inlined_call_operand.hbm [shape: f32[8,128], index: 7, kind: output, shape index: {}]  }
   0x1   :  { %13 = vsyncpa [#allocation6], 0 }
   0x2   :  { %14 = vsyncpa [#allocation9], 0 }
   0x3   :  { %15 = vsyncpa [#allocation4], 0  ;;  %s2173_s24 = smov [#allocation5]   ;;  %s2055_s28 = scalar_lea.hbm %s2330_s1, 1024 }
   0x4   :  { %s31_s25 = sshll.u32 %s2173_s24, 4  ;;  %p2056_p0 = scmp.ne.s32.totalorder %s2330_s1, %s2055_s28  ;;  %s32_s25 = int_to_ptr.vmem [resolvable:$true] %s31_s25 }
   0x5   :  { %p2059_p1 = scmp.lt.u32.totalorder %s2055_s28, %s2330_s1 }
   0x7   :  { %p2061_p2 = pnand %p2059_p1, %p2056_p0 }
   0x9   :  { %2064 = shalt.err (!%p2061_p2)
}
   0xa   :  { %s2065_s10 = scalar_lea.vmem %s32_s25, 1024  ;;  %p2070_p4 = scmp.lt.s32.totalorder %s32_s25, %s32_s25 }
   0xb   :  { %p2066_p3 = scmp.ne.s32.totalorder %s32_s25, %s2065_s10  ;;  %p2071_p5 = scmp.lt.s32.totalorder %s2065_s10, %s2065_s10 }
   0xd   :  { %p2072_p6 = por %p2071_p5, %p2070_p4 }
   0xf   :  { %p2073_p7 = pnand %p2072_p6, %p2066_p3 }
  0x11   :  { %2076 = shalt.err (!%p2073_p7)
}
  0x12   :  { %s2174_s11 = smov 256   ;;  %s2175_s12 = smov 16  }
  0x13   :  { %37 = dma.hbm_to_vmem [thread:$0]  %s2330_s1, 1024, %s32_s25, [#allocation6], %s2174_s11, %s2174_s11, %s2175_s12  }
  0x14   :  { %s2176_s15 = smov [#allocation2]   ;;  %s2177_s17 = smov [#allocation7]  }
  0x15   :  { %s22_s16 = sshll.u32 %s2176_s15, 4  ;;  %s45_s18 = sshll.u32 %s2177_s17, 4  ;;  %s23_s16 = int_to_ptr.vmem [resolvable:$true] %s22_s16  ;;  %s46_s18 = int_to_ptr.vmem [resolvable:$true] %s45_s18 }
  0x16   :  { %s2077_s21 = scalar_lea.hbm %s2329_s0, 64 }
  0x17   :  { %p2078_p8 = scmp.ne.s32.totalorder %s2329_s0, %s2077_s21  ;;  %p2081_p9 = scmp.lt.u32.totalorder %s2077_s21, %s2329_s0 }
  0x19   :  { %p2083_p10 = pnand %p2081_p9, %p2078_p8 }
  0x1b   :  { %2086 = shalt.err (!%p2083_p10)
}
  0x1c   :  { %s2087_s1 = scalar_lea.vmem %s23_s16, 64  ;;  %p2092_p12 = scmp.lt.s32.totalorder %s23_s16, %s23_s16 }
  0x1d   :  { %p2088_p11 = scmp.ne.s32.totalorder %s23_s16, %s2087_s1  ;;  %p2093_p13 = scmp.lt.s32.totalorder %s2087_s1, %s2087_s1 }
  0x1f   :  { %p2094_p0 = por %p2093_p13, %p2092_p12 }
  0x21   :  { %p2095_p1 = pnand %p2094_p0, %p2088_p11 }
  0x23   :  { %2098 = shalt.err (!%p2095_p1)
}
  0x24   :  { %25 = dma.hbm_to_vmem [thread:$0]  %s2329_s0, 64, %s23_s16, [#allocation3]  }
  0x25   :  { %s2099_s30 = scalar_lea.hbm %s2332_s3, 16384 }
  0x26   :  { %p2100_p2 = scmp.ne.s32.totalorder %s2332_s3, %s2099_s30  ;;  %p2103_p3 = scmp.lt.u32.totalorder %s2099_s30, %s2332_s3 }
  0x28   :  { %p2105_p4 = pnand %p2103_p3, %p2100_p2 }
  0x2a   :  { %2108 = shalt.err (!%p2105_p4)
}
  0x2b   :  { %s2109_s14 = scalar_lea.vmem %s46_s18, 16384  ;;  %p2114_p6 = scmp.lt.s32.totalorder %s46_s18, %s46_s18 }
  0x2c   :  { %p2110_p5 = scmp.ne.s32.totalorder %s46_s18, %s2109_s14  ;;  %p2115_p7 = scmp.lt.s32.totalorder %s2109_s14, %s2109_s14 }
  0x2e   :  { %p2116_p8 = por %p2115_p7, %p2114_p6 }
  0x30   :  { %p2117_p9 = pnand %p2116_p8, %p2110_p5 }
  0x32   :  { %2120 = shalt.err (!%p2117_p9)
}
  0x33   :  { %51 = dma.hbm_to_vmem [thread:$0]  %s2332_s3, 16384, %s46_s18, [#allocation6], %s2174_s11, %s2174_s11, %s2175_s12  }
  0x34   :  { %s2178_s16 = smov [#allocation8]   ;;  %s2121_s21 = scalar_lea.hbm %s2334_s5, 4096 }
  0x35   :  { %s59_s17 = sshll.u32 %s2178_s16, 4  ;;  %p2122_p10 = scmp.ne.s32.totalorder %s2334_s5, %s2121_s21  ;;  %s60_s17 = int_to_ptr.vmem [resolvable:$true] %s59_s17 }
  0x36   :  { %p2125_p11 = scmp.lt.u32.totalorder %s2121_s21, %s2334_s5 }
  0x38   :  { %p2127_p12 = pnand %p2125_p11, %p2122_p10 }
  0x3a   :  { %2130 = shalt.err (!%p2127_p12)
}
  0x3b   :  { %s2131_s1 = scalar_lea.vmem %s60_s17, 4096  ;;  %p2136_p0 = scmp.lt.s32.totalorder %s60_s17, %s60_s17 }
  0x3c   :  { %p2132_p13 = scmp.ne.s32.totalorder %s60_s17, %s2131_s1  ;;  %p2137_p1 = scmp.lt.s32.totalorder %s2131_s1, %s2131_s1 }
  0x3e   :  { %p2138_p2 = por %p2137_p1, %p2136_p0 }
  0x40   :  { %p2139_p3 = pnand %p2138_p2, %p2132_p13 }
  0x42   :  { %2142 = shalt.err (!%p2139_p3)
}
  0x43   :  { %s2179_s3 = smov 64   ;;  %s2180_s11 = smov 4  }
  0x44   :  { %65 = dma.hbm_to_vmem [thread:$0]  %s2334_s5, 4096, %s60_s17, [#allocation9], %s2179_s3, %s2179_s3, %s2180_s11  }
  0x45   :  { %2165 = dma.done.wait [#allocation3], 64  }
  0x46   :  { %2166 = vsyncadd [#allocation3], 4294967232 }
  0x47   :  { %2167 = dma.done.wait [#allocation6], 17408  }
  0x48   :  { %2168 = vsyncadd [#allocation6], 4294949888 }
  0x49   :  { %2169 = dma.done.wait [#allocation9], 4096  }
  0x4a   :  { %2170 = vsyncadd [#allocation9], 4294963200  ;;  %v2181_v0 = vmov 0   ;;  %v1815_v1 = vld [vmem:[#allocation5 + $0x4] ss:$16 sps:$4 sm:$0xff]   ;;  %vm152_vm0 = vcmask 261120  }
  0x4b   :  { %188 = vmatprep.mubr.bf16.mxu0 %v2181_v0  ;;  %229 = vmatprep.mubr.bf16.mxu1 %v2181_v0  ;;  %v1817_v2 = vld [vmem:[#allocation5] ss:$16 sps:$4 sm:$0xff]   ;;  %v1818_v3 = vld [vmem:[#allocation5 + $0x24] ss:$16 sps:$4 sm:$0xff]   ;;  %v1821_v5 = vld [vmem:[#allocation5 + $0xc] ss:$16 sps:$4 sm:$0xff]  }
  0x4c   :  { %156 = vmatprep.subr.bf16.mxu0 %v1815_v1  ;;  %v1820_v4 = vld [vmem:[#allocation5 + $0x20] ss:$16 sps:$4 sm:$0xff]   ;;  %v1823_v6 = vld [vmem:[#allocation5 + $0x8] ss:$16 sps:$4 sm:$0xff]   ;;  %v81_v7 = vld [vmem:[#allocation2] sm:$0xf]  ;;  %197 = vmatprep.subr.bf16.mxu1 %v1821_v5 }
  0x4d   :  { %157 = vmatpush1.bf16.msra.mxu0 %v1817_v2  ;;  %v1824_v8 = vld [vmem:[#allocation5 + $0x2c] ss:$16 sps:$4 sm:$0xff]   ;;  %198 = vmatpush1.bf16.msra.mxu1 %v1823_v6  ;;  %v1826_v9 = vld [vmem:[#allocation5 + $0x28] ss:$16 sps:$4 sm:$0xff]   ;;  %v1829_v10 = vld [vmem:[#allocation7 + $0x4] ss:$16 sps:$4 sm:$0xff]  }
  0x4e   :  { %158 = vmatprep.subr.bf16.mxu0 %v1818_v3  ;;  %199 = vmatprep.subr.bf16.mxu1 %v1824_v8  ;;  %v1827_v11 = vld [vmem:[#allocation7] ss:$16 sps:$4 sm:$0xff]   ;;  %v1832_v12 = vld [vmem:[#allocation7 + $0xc] ss:$16 sps:$4 sm:$0xff]   ;;  %v1835_v13 = vld [vmem:[#allocation7 + $0x24] ss:$16 sps:$4 sm:$0xff]  }
  0x4f   :  { %v1830_v14 = vld [vmem:[#allocation7 + $0x8] ss:$16 sps:$4 sm:$0xff]   ;;  %v1833_v15 = vld [vmem:[#allocation7 + $0x20] ss:$16 sps:$4 sm:$0xff]   ;;  %v1838_v16 = vld [vmem:[#allocation7 + $0x2c] ss:$16 sps:$4 sm:$0xff]  }
  0x50   :  { %v1841_v17 = vld [vmem:[#allocation7 + $0x44] ss:$16 sps:$4 sm:$0xff]   ;;  %v1836_v18 = vld [vmem:[#allocation7 + $0x28] ss:$16 sps:$4 sm:$0xff]   ;;  %v1839_v19 = vld [vmem:[#allocation7 + $0x40] ss:$16 sps:$4 sm:$0xff]  }
  0x51   :  { %159 = vmatpush1.bf16.msra.mxu0 %v1820_v4  ;;  %200 = vmatpush1.bf16.msra.mxu1 %v1826_v9  ;;  %v1844_v20 = vld [vmem:[#allocation7 + $0x4c] ss:$16 sps:$4 sm:$0xff]   ;;  %v1847_v21 = vld [vmem:[#allocation7 + $0x64] ss:$16 sps:$4 sm:$0xff]   ;;  %v1842_v22 = vld [vmem:[#allocation7 + $0x48] ss:$16 sps:$4 sm:$0xff]  }
  0x52   :  { %1036 = vmatprep.subr.bf16.mxu0 %v1829_v10  ;;  %1118 = vmatprep.subr.bf16.mxu1 %v1832_v12  ;;  %v1845_v23 = vld [vmem:[#allocation7 + $0x60] ss:$16 sps:$4 sm:$0xff]   ;;  %v1850_v24 = vld [vmem:[#allocation7 + $0x6c] ss:$16 sps:$4 sm:$0xff]   ;;  %v1853_v25 = vld [vmem:[#allocation7 + $0x84] ss:$16 sps:$4 sm:$0xff]   ;;  %v92_v12 = vlaneseq }
  0x53   :  { %v1848_v26 = vld [vmem:[#allocation7 + $0x68] ss:$16 sps:$4 sm:$0xff]   ;;  %v1851_v27 = vld [vmem:[#allocation7 + $0x80] ss:$16 sps:$4 sm:$0xff]   ;;  %v1856_v28 = vld [vmem:[#allocation7 + $0x8c] ss:$16 sps:$4 sm:$0xff]  }
  0x54   :  { %1586 = vmatmul.mubr.msk.bf16.vlgmr.msra.gmra.mrb[0].mxu0 %vm152_vm0, %v81_v7  ;;  %1587 = vmatmul.mubr.msk.bf16.vlgmr.msra.gmra.mrb[0].mxu1 %vm152_vm0, %v81_v7  ;;  %v1859_v29 = vld [vmem:[#allocation7 + $0xa4] ss:$16 sps:$4 sm:$0xff]   ;;  %v1854_v30 = vld [vmem:[#allocation7 + $0x88] ss:$16 sps:$4 sm:$0xff]   ;;  %v1857_v31 = vld [vmem:[#allocation7 + $0xa0] ss:$16 sps:$4 sm:$0xff]  }
  0x55   :  { %1037 = vmatpush1.bf16.msra.mxu0 %v1827_v11  ;;  %1119 = vmatpush1.bf16.msra.mxu1 %v1830_v14  ;;  %v1862_v32 = vld [vmem:[#allocation7 + $0xac] ss:$16 sps:$4 sm:$0xff]   ;;  %v1865_v33 = vld [vmem:[#allocation7 + $0xc4] ss:$16 sps:$4 sm:$0xff]   ;;  %v1860_v34 = vld [vmem:[#allocation7 + $0xa8] ss:$16 sps:$4 sm:$0xff]  }
  0x56   :  { %1038 = vmatprep.subr.bf16.mxu0 %v1835_v13  ;;  %1120 = vmatprep.subr.bf16.mxu1 %v1838_v16  ;;  %v1863_v35 = vld [vmem:[#allocation7 + $0xc0] ss:$16 sps:$4 sm:$0xff]   ;;  %v1868_v36 = vld [vmem:[#allocation7 + $0xcc] ss:$16 sps:$4 sm:$0xff]   ;;  %v1871_v37 = vld [vmem:[#allocation7 + $0xe4] ss:$16 sps:$4 sm:$0xff]  }
  0x57   :  { %v1866_v38 = vld [vmem:[#allocation7 + $0xc8] ss:$16 sps:$4 sm:$0xff]   ;;  %v1869_v39 = vld [vmem:[#allocation7 + $0xe0] ss:$16 sps:$4 sm:$0xff]   ;;  %v1874_v40 = vld [vmem:[#allocation7 + $0xec] ss:$16 sps:$4 sm:$0xff]  }
  0x58   :  { %v1877_v41 = vld [vmem:[#allocation7 + $0x104] ss:$16 sps:$4 sm:$0xff]   ;;  %v1872_v42 = vld [vmem:[#allocation7 + $0xe8] ss:$16 sps:$4 sm:$0xff]   ;;  %v1875_v43 = vld [vmem:[#allocation7 + $0x100] ss:$16 sps:$4 sm:$0xff]  }
  0x59   :  { %1039 = vmatpush1.bf16.msra.mxu0 %v1833_v15  ;;  %1121 = vmatpush1.bf16.msra.mxu1 %v1836_v18  ;;  %v1880_v44 = vld [vmem:[#allocation7 + $0x10c] ss:$16 sps:$4 sm:$0xff]   ;;  %v1883_v45 = vld [vmem:[#allocation7 + $0x124] ss:$16 sps:$4 sm:$0xff]   ;;  %v1878_v46 = vld [vmem:[#allocation7 + $0x108] ss:$16 sps:$4 sm:$0xff]  }
  0x5a   :  { %1040 = vmatprep.subr.bf16.mxu0 %v1841_v17  ;;  %1122 = vmatprep.subr.bf16.mxu1 %v1844_v20  ;;  %v1881_v47 = vld [vmem:[#allocation7 + $0x120] ss:$16 sps:$4 sm:$0xff]   ;;  %v1886_v48 = vld [vmem:[#allocation7 + $0x12c] ss:$16 sps:$4 sm:$0xff]   ;;  %v1889_v49 = vld [vmem:[#allocation7 + $0x144] ss:$16 sps:$4 sm:$0xff]  }
  0x5b   :  { %v1884_v50 = vld [vmem:[#allocation7 + $0x128] ss:$16 sps:$4 sm:$0xff]   ;;  %v1887_v51 = vld [vmem:[#allocation7 + $0x140] ss:$16 sps:$4 sm:$0xff]   ;;  %v1892_v52 = vld [vmem:[#allocation7 + $0x14c] ss:$16 sps:$4 sm:$0xff]  }
  0x5c   :  { %v1895_v53 = vld [vmem:[#allocation7 + $0x164] ss:$16 sps:$4 sm:$0xff]   ;;  %v1890_v54 = vld [vmem:[#allocation7 + $0x148] ss:$16 sps:$4 sm:$0xff]   ;;  %v1893_v55 = vld [vmem:[#allocation7 + $0x160] ss:$16 sps:$4 sm:$0xff]  }
  0x5d   :  { %1041 = vmatpush1.bf16.msra.mxu0 %v1839_v19  ;;  %1123 = vmatpush1.bf16.msra.mxu1 %v1842_v22  ;;  %v1898_v56 = vld [vmem:[#allocation7 + $0x16c] ss:$16 sps:$4 sm:$0xff]   ;;  %v1901_v57 = vld [vmem:[#allocation7 + $0x184] ss:$16 sps:$4 sm:$0xff]   ;;  %v1896_v58 = vld [vmem:[#allocation7 + $0x168] ss:$16 sps:$4 sm:$0xff]  }
  0x5e   :  { %1042 = vmatprep.subr.bf16.mxu0 %v1847_v21  ;;  %1124 = vmatprep.subr.bf16.mxu1 %v1850_v24  ;;  %v1899_v59 = vld [vmem:[#allocation7 + $0x180] ss:$16 sps:$4 sm:$0xff]   ;;  %v1904_v60 = vld [vmem:[#allocation7 + $0x18c] ss:$16 sps:$4 sm:$0xff]   ;;  %v1907_v61 = vld [vmem:[#allocation7 + $0x1a4] ss:$16 sps:$4 sm:$0xff]  }
  0x5f   :  { %v1902_v62 = vld [vmem:[#allocation7 + $0x188] ss:$16 sps:$4 sm:$0xff]   ;;  %v1905_v63 = vld [vmem:[#allocation7 + $0x1a0] ss:$16 sps:$4 sm:$0xff]   ;;  %v1910_v0 = vld [vmem:[#allocation7 + $0x1ac] ss:$16 sps:$4 sm:$0xff]  }
  0x60   :  { %v1908_v1 = vld [vmem:[#allocation7 + $0x1a8] ss:$16 sps:$4 sm:$0xff]   ;;  %v1913_v2 = vld [vmem:[#allocation7 + $0x1c4] ss:$16 sps:$4 sm:$0xff]   ;;  %v1916_v3 = vld [vmem:[#allocation7 + $0x1cc] ss:$16 sps:$4 sm:$0xff]  }
  0x61   :  { %1043 = vmatpush1.bf16.msra.mxu0 %v1845_v23  ;;  %1125 = vmatpush1.bf16.msra.mxu1 %v1848_v26  ;;  %v1911_v4 = vld [vmem:[#allocation7 + $0x1c0] ss:$16 sps:$4 sm:$0xff]   ;;  %v1914_v5 = vld [vmem:[#allocation7 + $0x1c8] ss:$16 sps:$4 sm:$0xff]   ;;  %v1919_v6 = vld [vmem:[#allocation7 + $0x1e4] ss:$16 sps:$4 sm:$0xff]  }
  0x62   :  { %1044 = vmatprep.subr.bf16.mxu0 %v1853_v25  ;;  %1126 = vmatprep.subr.bf16.mxu1 %v1856_v28  ;;  %v1922_v7 = vld [vmem:[#allocation7 + $0x1ec] ss:$16 sps:$4 sm:$0xff]   ;;  %v1917_v8 = vld [vmem:[#allocation7 + $0x1e0] ss:$16 sps:$4 sm:$0xff]   ;;  %v1920_v9 = vld [vmem:[#allocation7 + $0x1e8] ss:$16 sps:$4 sm:$0xff]  }
  0x63   :  { %v1925_v10 = vld [vmem:[#allocation7 + $0x204] ss:$16 sps:$4 sm:$0xff]   ;;  %v1928_v11 = vld [vmem:[#allocation7 + $0x20c] ss:$16 sps:$4 sm:$0xff]   ;;  %v2277_v13 = vshrl.u32 %v92_v12, 7 }
  0x64   :  { %v2283_v15 = vld [vmem:[%s2331_s2] sm:$0xf]  ;;  %v1985_v12 = vld [vmem:[#allocation7 + $0x344] ss:$16 sps:$4 sm:$0xff]  }
  0x65   :  { %1045 = vmatpush1.bf16.msra.mxu0 %v1851_v27  ;;  %1127 = vmatpush1.bf16.msra.mxu1 %v1854_v30  ;;  %v94_v14 = vsub.s32 0, %v2277_v13  ;;  %v98_v16 = vsub.s32 1, %v2277_v13  ;;  %v106_v18 = vsub.s32 3, %v2277_v13 }
  0x66   :  { %1046 = vmatprep.subr.bf16.mxu0 %v1859_v29  ;;  %1128 = vmatprep.subr.bf16.mxu1 %v1862_v32 }
  0x67   :  { %v95_v17 = vrot.slane %v2283_v15, %v94_v14  ;;  %v99_v19 = vrot.slane %v2283_v15, %v98_v16  ;;  %v107_v23 = vrot.slane %v2283_v15, %v106_v18 }
  0x69   :  { %1047 = vmatpush1.bf16.msra.mxu0 %v1857_v31  ;;  %1129 = vmatpush1.bf16.msra.mxu1 %v1860_v34  ;;  %v1923_v34 = vld [vmem:[#allocation7 + $0x200] ss:$16 sps:$4 sm:$0xff]  }
  0x6a   :  { %1048 = vmatprep.subr.bf16.mxu0 %v1865_v33  ;;  %1130 = vmatprep.subr.bf16.mxu1 %v1868_v36 }
  0x6d   :  { %1049 = vmatpush1.bf16.msra.mxu0 %v1863_v35  ;;  %1131 = vmatpush1.bf16.msra.mxu1 %v1866_v38  ;;  %v1926_v35 = vld [vmem:[#allocation7 + $0x208] ss:$16 sps:$4 sm:$0xff]   ;;  %v1931_v38 = vld [vmem:[#allocation7 + $0x224] ss:$16 sps:$4 sm:$0xff]  }
  0x6e   :  { %1050 = vmatprep.subr.bf16.mxu0 %v1871_v37  ;;  %1132 = vmatprep.subr.bf16.mxu1 %v1874_v40 }
  0x71   :  { %1051 = vmatpush1.bf16.msra.mxu0 %v1869_v39  ;;  %1133 = vmatpush1.bf16.msra.mxu1 %v1872_v42  ;;  %v1934_v39 = vld [vmem:[#allocation7 + $0x22c] ss:$16 sps:$4 sm:$0xff]   ;;  %v1929_v42 = vld [vmem:[#allocation7 + $0x220] ss:$16 sps:$4 sm:$0xff]  }
  0x72   :  { %1052 = vmatprep.subr.bf16.mxu0 %v1877_v41  ;;  %1134 = vmatprep.subr.bf16.mxu1 %v1880_v44  ;;  %v1937_v44 = vld [vmem:[#allocation7 + $0x244] ss:$16 sps:$4 sm:$0xff]  }
  0x75   :  { %1053 = vmatpush1.bf16.msra.mxu0 %v1875_v43  ;;  %1135 = vmatpush1.bf16.msra.mxu1 %v1878_v46  ;;  %v1932_v43 = vld [vmem:[#allocation7 + $0x228] ss:$16 sps:$4 sm:$0xff]   ;;  %v1935_v46 = vld [vmem:[#allocation7 + $0x240] ss:$16 sps:$4 sm:$0xff]  }
  0x76   :  { %1054 = vmatprep.subr.bf16.mxu0 %v1883_v45  ;;  %1136 = vmatprep.subr.bf16.mxu1 %v1886_v48  ;;  %v1940_v45 = vld [vmem:[#allocation7 + $0x24c] ss:$16 sps:$4 sm:$0xff]   ;;  %v1943_v48 = vld [vmem:[#allocation7 + $0x264] ss:$16 sps:$4 sm:$0xff]  }
  0x79   :  { %1055 = vmatpush1.bf16.msra.mxu0 %v1881_v47  ;;  %1137 = vmatpush1.bf16.msra.mxu1 %v1884_v50  ;;  %v1938_v47 = vld [vmem:[#allocation7 + $0x248] ss:$16 sps:$4 sm:$0xff]   ;;  %v1941_v50 = vld [vmem:[#allocation7 + $0x260] ss:$16 sps:$4 sm:$0xff]  }
  0x7a   :  { %1056 = vmatprep.subr.bf16.mxu0 %v1889_v49  ;;  %1138 = vmatprep.subr.bf16.mxu1 %v1892_v52  ;;  %v1946_v49 = vld [vmem:[#allocation7 + $0x26c] ss:$16 sps:$4 sm:$0xff]   ;;  %v1949_v52 = vld [vmem:[#allocation7 + $0x284] ss:$16 sps:$4 sm:$0xff]  }
  0x7d   :  { %1057 = vmatpush1.bf16.msra.mxu0 %v1887_v51  ;;  %1139 = vmatpush1.bf16.msra.mxu1 %v1890_v54  ;;  %v1944_v51 = vld [vmem:[#allocation7 + $0x268] ss:$16 sps:$4 sm:$0xff]   ;;  %v1947_v54 = vld [vmem:[#allocation7 + $0x280] ss:$16 sps:$4 sm:$0xff]  }
  0x7e   :  { %1058 = vmatprep.subr.bf16.mxu0 %v1895_v53  ;;  %1140 = vmatprep.subr.bf16.mxu1 %v1898_v56  ;;  %v1952_v53 = vld [vmem:[#allocation7 + $0x28c] ss:$16 sps:$4 sm:$0xff]   ;;  %v1955_v56 = vld [vmem:[#allocation7 + $0x2a4] ss:$16 sps:$4 sm:$0xff]  }
  0x81   :  { %1059 = vmatpush1.bf16.msra.mxu0 %v1893_v55  ;;  %1141 = vmatpush1.bf16.msra.mxu1 %v1896_v58  ;;  %v1950_v55 = vld [vmem:[#allocation7 + $0x288] ss:$16 sps:$4 sm:$0xff]   ;;  %v1953_v58 = vld [vmem:[#allocation7 + $0x2a0] ss:$16 sps:$4 sm:$0xff]  }
  0x82   :  { %1060 = vmatprep.subr.bf16.mxu0 %v1901_v57  ;;  %1142 = vmatprep.subr.bf16.mxu1 %v1904_v60  ;;  %v1958_v57 = vld [vmem:[#allocation7 + $0x2ac] ss:$16 sps:$4 sm:$0xff]   ;;  %v1961_v60 = vld [vmem:[#allocation7 + $0x2c4] ss:$16 sps:$4 sm:$0xff]  }
  0x85   :  { %1061 = vmatpush1.bf16.msra.mxu0 %v1899_v59  ;;  %1143 = vmatpush1.bf16.msra.mxu1 %v1902_v62  ;;  %v1956_v59 = vld [vmem:[#allocation7 + $0x2a8] ss:$16 sps:$4 sm:$0xff]   ;;  %v1959_v62 = vld [vmem:[#allocation7 + $0x2c0] ss:$16 sps:$4 sm:$0xff]  }
  0x86   :  { %1062 = vmatprep.subr.bf16.mxu0 %v1907_v61  ;;  %1144 = vmatprep.subr.bf16.mxu1 %v1910_v0  ;;  %v1964_v61 = vld [vmem:[#allocation7 + $0x2cc] ss:$16 sps:$4 sm:$0xff]   ;;  %v1967_v0 = vld [vmem:[#allocation7 + $0x2e4] ss:$16 sps:$4 sm:$0xff]  }
  0x89   :  { %1063 = vmatpush1.bf16.msra.mxu0 %v1905_v63  ;;  %1145 = vmatpush1.bf16.msra.mxu1 %v1908_v1  ;;  %v1962_v63 = vld [vmem:[#allocation7 + $0x2c8] ss:$16 sps:$4 sm:$0xff]   ;;  %v1970_v1 = vld [vmem:[#allocation7 + $0x2ec] ss:$16 sps:$4 sm:$0xff]  }
  0x8a   :  { %1064 = vmatprep.subr.bf16.mxu0 %v1913_v2  ;;  %1146 = vmatprep.subr.bf16.mxu1 %v1916_v3  ;;  %v1965_v2 = vld [vmem:[#allocation7 + $0x2e0] ss:$16 sps:$4 sm:$0xff]   ;;  %v1968_v3 = vld [vmem:[#allocation7 + $0x2e8] ss:$16 sps:$4 sm:$0xff]  }
  0x8d   :  { %1065 = vmatpush1.bf16.msra.mxu0 %v1911_v4  ;;  %1147 = vmatpush1.bf16.msra.mxu1 %v1914_v5  ;;  %v1973_v4 = vld [vmem:[#allocation7 + $0x304] ss:$16 sps:$4 sm:$0xff]   ;;  %v1976_v5 = vld [vmem:[#allocation7 + $0x30c] ss:$16 sps:$4 sm:$0xff]  }
  0x8e   :  { %1066 = vmatprep.subr.bf16.mxu0 %v1919_v6  ;;  %1148 = vmatprep.subr.bf16.mxu1 %v1922_v7  ;;  %v1971_v6 = vld [vmem:[#allocation7 + $0x300] ss:$16 sps:$4 sm:$0xff]   ;;  %v1974_v7 = vld [vmem:[#allocation7 + $0x308] ss:$16 sps:$4 sm:$0xff]  }
  0x91   :  { %1067 = vmatpush1.bf16.msra.mxu0 %v1917_v8  ;;  %1149 = vmatpush1.bf16.msra.mxu1 %v1920_v9  ;;  %v1979_v8 = vld [vmem:[#allocation7 + $0x324] ss:$16 sps:$4 sm:$0xff]   ;;  %v1982_v9 = vld [vmem:[#allocation7 + $0x32c] ss:$16 sps:$4 sm:$0xff]  }
  0x92   :  { %1077 = vmatprep.subr.bf16.mxu0 %v1925_v10  ;;  %1159 = vmatprep.subr.bf16.mxu1 %v1928_v11  ;;  %v1977_v10 = vld [vmem:[#allocation7 + $0x320] ss:$16 sps:$4 sm:$0xff]   ;;  %v1980_v11 = vld [vmem:[#allocation7 + $0x328] ss:$16 sps:$4 sm:$0xff]  }
 0x127   :  { %v190_v20 = vpop.f32.mrb[0].mxu0  ;;  %v2296_v28 = vpop.f32.mrb[0].mxu1 }
 0x128   :  { %v191_v21 = vadd.f32 %v190_v20, %v95_v17  ;;  %v192_v22 = vpop.f32.mrb[1].mxu0  ;;  %v233_v30 = vpop.f32.mrb[1].mxu1  ;;  %v1988_v17 = vld [vmem:[#allocation7 + $0x34c] ss:$16 sps:$4 sm:$0xff]   ;;  %v1986_v20 = vld [vmem:[#allocation7 + $0x348] ss:$16 sps:$4 sm:$0xff]  }
 0x129   :  { %v193_v24 = vadd.f32 %v192_v22, %v99_v19  ;;  %v194_v25 = vpop.f32.mrb[2].mxu0  ;;  %v234_v31 = vadd.f32 %v233_v30, %v107_v23  ;;  %v235_v32 = vpop.f32.mrb[2].mxu1  ;;  %v1983_v19 = vld [vmem:[#allocation7 + $0x340] ss:$16 sps:$4 sm:$0xff]   ;;  %v1994_v22 = vld [vmem:[#allocation7 + $0x36c] ss:$16 sps:$4 sm:$0xff]  }
 0x12a   :  { %v238_v26 = vmax.f32 %v191_v21, 0.0  ;;  %v195_v27 = vpop.f32.mrb[3].mxu0  ;;  %v236_v36 = vpop.f32.mrb[3].mxu1  ;;  %v1991_v21 = vld [vmem:[#allocation7 + $0x364] ss:$16 sps:$4 sm:$0xff]   ;;  %v102_v30 = vsub.s32 2, %v2277_v13 }
 0x12b   :  { %v239_v29 = vmax.f32 %v193_v24, 0.0  ;;  %v241_v40 = vmax.f32 %v234_v31, 0.0  ;;  %v1989_v23 = vld [vmem:[#allocation7 + $0x360] ss:$16 sps:$4 sm:$0xff]   ;;  %v1992_v24 = vld [vmem:[#allocation7 + $0x368] ss:$16 sps:$4 sm:$0xff]  }
 0x12c   :  { %v242_v37 = vpack.c.bf16 %v238_v26, %v238_v26  ;;  %v1997_v25 = vld [vmem:[#allocation7 + $0x384] ss:$16 sps:$4 sm:$0xff]   ;;  %v2000_v26 = vld [vmem:[#allocation7 + $0x38c] ss:$16 sps:$4 sm:$0xff]   ;;  %v1995_v27 = vld [vmem:[#allocation7 + $0x380] ss:$16 sps:$4 sm:$0xff]  }
 0x12d   :  { %v243_v33 = vpack.c.bf16 %v239_v29, %v239_v29  ;;  %v245_v41 = vpack.c.bf16 %v241_v40, %v241_v40  ;;  %v1998_v29 = vld [vmem:[#allocation7 + $0x388] ss:$16 sps:$4 sm:$0xff]   ;;  %v2003_v31 = vld [vmem:[#allocation7 + $0x3a4] ss:$16 sps:$4 sm:$0xff]   ;;  %v2006_v32 = vld [vmem:[#allocation7 + $0x3ac] ss:$16 sps:$4 sm:$0xff]  }
 0x12e   :  { %v2009_v36 = vld [vmem:[#allocation7 + $0x3c4] ss:$16 sps:$4 sm:$0xff]  }
 0x12f   :  { %1068 = vmatprep.mubr.bf16.mxu0 %v243_v33  ;;  %1150 = vmatprep.mubr.bf16.mxu1 %v243_v33  ;;  %v2001_v33 = vld [vmem:[#allocation7 + $0x3a0] ss:$16 sps:$4 sm:$0xff]  }
 0x130   :  { %1069 = vmatmul.mubr.bf16.vlgmr.msra.gmra.mrb[4].mxu0 %v242_v37  ;;  %1151 = vmatmul.mubr.bf16.vlgmr.msra.gmra.mrb[4].mxu1 %v242_v37  ;;  %v2012_v37 = vld [vmem:[#allocation7 + $0x3cc] ss:$16 sps:$4 sm:$0xff]  }
 0x131   :  { %1078 = vmatpush1.bf16.msra.mxu0 %v1923_v34  ;;  %1160 = vmatpush1.bf16.msra.mxu1 %v1926_v35  ;;  %v2004_v34 = vld [vmem:[#allocation7 + $0x3a8] ss:$16 sps:$4 sm:$0xff]   ;;  %v103_v35 = vrot.slane %v2283_v15, %v102_v30  ;;  %v2019_v15 = vld [vmem:[#allocation8 + $0x40] sm:$0xff]  }
 0x132   :  { %1079 = vmatprep.subr.bf16.mxu0 %v1931_v38  ;;  %1161 = vmatprep.subr.bf16.mxu1 %v1934_v39  ;;  %v2007_v38 = vld [vmem:[#allocation7 + $0x3c0] ss:$16 sps:$4 sm:$0xff]   ;;  %v2010_v39 = vld [vmem:[#allocation7 + $0x3c8] ss:$16 sps:$4 sm:$0xff]  }
 0x133   :  { %1109 = vmatprep.mubr.bf16.mxu0 %v245_v41  ;;  %1191 = vmatprep.mubr.bf16.mxu1 %v245_v41  ;;  %v232_v40 = vadd.f32 %v2296_v28, %v103_v35  ;;  %v2015_v41 = vld [vmem:[#allocation7 + $0x3e4] ss:$16 sps:$4 sm:$0xff]   ;;  %v2023_v28 = vld [vmem:[#allocation8 + $0x48] sm:$0xff]  }
 0x135   :  { %1080 = vmatpush1.bf16.msra.mxu0 %v1929_v42  ;;  %1162 = vmatpush1.bf16.msra.mxu1 %v1932_v43  ;;  %v2018_v42 = vld [vmem:[#allocation7 + $0x3ec] ss:$16 sps:$4 sm:$0xff]   ;;  %v2013_v43 = vld [vmem:[#allocation7 + $0x3e0] ss:$16 sps:$4 sm:$0xff]  }
 0x136   :  { %1081 = vmatprep.subr.bf16.mxu0 %v1937_v44  ;;  %1163 = vmatprep.subr.bf16.mxu1 %v1940_v45  ;;  %v2016_v44 = vld [vmem:[#allocation7 + $0x3e8] ss:$16 sps:$4 sm:$0xff]   ;;  %v240_v45 = vmax.f32 %v232_v40, 0.0 }
 0x139   :  { %1082 = vmatpush1.bf16.msra.mxu0 %v1935_v46  ;;  %1164 = vmatpush1.bf16.msra.mxu1 %v1938_v47  ;;  %v2020_v46 = vld [vmem:[#allocation8 + $0xc0] sm:$0xff]  }
 0x13a   :  { %1083 = vmatprep.subr.bf16.mxu0 %v1943_v48  ;;  %1165 = vmatprep.subr.bf16.mxu1 %v1946_v49  ;;  %v2021_v47 = vld [vmem:[#allocation8] sm:$0xff]   ;;  %v244_v49 = vpack.c.bf16 %v240_v45, %v240_v45 }
 0x13b   :  { %v2022_v48 = vld [vmem:[#allocation8 + $0x80] sm:$0xff]  }
 0x13d   :  { %1084 = vmatpush1.bf16.msra.mxu0 %v1941_v50  ;;  %1166 = vmatpush1.bf16.msra.mxu1 %v1944_v51  ;;  %v2024_v50 = vld [vmem:[#allocation8 + $0xc8] sm:$0xff]  }
 0x13e   :  { %1085 = vmatprep.subr.bf16.mxu0 %v1949_v52  ;;  %1167 = vmatprep.subr.bf16.mxu1 %v1952_v53  ;;  %v2025_v51 = vld [vmem:[#allocation8 + $0x8] sm:$0xff]   ;;  %v2027_v53 = vld [vmem:[#allocation8 + $0x50] sm:$0xff]  }
 0x13f   :  { %v2026_v52 = vld [vmem:[#allocation8 + $0x88] sm:$0xff]  }
 0x141   :  { %1086 = vmatpush1.bf16.msra.mxu0 %v1947_v54  ;;  %1168 = vmatpush1.bf16.msra.mxu1 %v1950_v55  ;;  %v2028_v54 = vld [vmem:[#allocation8 + $0xd0] sm:$0xff]  }
 0x142   :  { %1087 = vmatprep.subr.bf16.mxu0 %v1955_v56  ;;  %1169 = vmatprep.subr.bf16.mxu1 %v1958_v57  ;;  %v2029_v55 = vld [vmem:[#allocation8 + $0x10] sm:$0xff]   ;;  %v2031_v57 = vld [vmem:[#allocation8 + $0x58] sm:$0xff]  }
 0x143   :  { %v2030_v56 = vld [vmem:[#allocation8 + $0x90] sm:$0xff]  }
 0x145   :  { %1088 = vmatpush1.bf16.msra.mxu0 %v1953_v58  ;;  %1170 = vmatpush1.bf16.msra.mxu1 %v1956_v59  ;;  %v2032_v58 = vld [vmem:[#allocation8 + $0xd8] sm:$0xff]  }
 0x146   :  { %1089 = vmatprep.subr.bf16.mxu0 %v1961_v60  ;;  %1171 = vmatprep.subr.bf16.mxu1 %v1964_v61  ;;  %v2033_v59 = vld [vmem:[#allocation8 + $0x18] sm:$0xff]   ;;  %v2035_v61 = vld [vmem:[#allocation8 + $0x60] sm:$0xff]  }
 0x147   :  { %v2034_v60 = vld [vmem:[#allocation8 + $0x98] sm:$0xff]  }
 0x149   :  { %1090 = vmatpush1.bf16.msra.mxu0 %v1959_v62  ;;  %1172 = vmatpush1.bf16.msra.mxu1 %v1962_v63  ;;  %v2036_v62 = vld [vmem:[#allocation8 + $0xe0] sm:$0xff]  }
 0x14a   :  { %1091 = vmatprep.subr.bf16.mxu0 %v1967_v0  ;;  %1173 = vmatprep.subr.bf16.mxu1 %v1970_v1  ;;  %v2037_v63 = vld [vmem:[#allocation8 + $0x20] sm:$0xff]   ;;  %v2039_v1 = vld [vmem:[#allocation8 + $0x68] sm:$0xff]  }
 0x14b   :  { %v2038_v0 = vld [vmem:[#allocation8 + $0xa0] sm:$0xff]  }
 0x14d   :  { %1092 = vmatpush1.bf16.msra.mxu0 %v1965_v2  ;;  %1174 = vmatpush1.bf16.msra.mxu1 %v1968_v3  ;;  %v2040_v2 = vld [vmem:[#allocation8 + $0xe8] sm:$0xff]  }
 0x14e   :  { %1093 = vmatprep.subr.bf16.mxu0 %v1973_v4  ;;  %1175 = vmatprep.subr.bf16.mxu1 %v1976_v5  ;;  %v2041_v3 = vld [vmem:[#allocation8 + $0x28] sm:$0xff]   ;;  %v2043_v5 = vld [vmem:[#allocation8 + $0x70] sm:$0xff]  }
 0x14f   :  { %v2042_v4 = vld [vmem:[#allocation8 + $0xa8] sm:$0xff]  }
 0x151   :  { %1094 = vmatpush1.bf16.msra.mxu0 %v1971_v6  ;;  %1176 = vmatpush1.bf16.msra.mxu1 %v1974_v7  ;;  %v2044_v6 = vld [vmem:[#allocation8 + $0xf0] sm:$0xff]  }
 0x152   :  { %1095 = vmatprep.subr.bf16.mxu0 %v1979_v8  ;;  %1177 = vmatprep.subr.bf16.mxu1 %v1982_v9  ;;  %v2045_v7 = vld [vmem:[#allocation8 + $0x30] sm:$0xff]   ;;  %v2047_v9 = vld [vmem:[#allocation8 + $0x78] sm:$0xff]  }
 0x153   :  { %v2046_v8 = vld [vmem:[#allocation8 + $0xb0] sm:$0xff]  }
 0x155   :  { %1096 = vmatpush1.bf16.msra.mxu0 %v1977_v10  ;;  %1178 = vmatpush1.bf16.msra.mxu1 %v1980_v11  ;;  %v2048_v10 = vld [vmem:[#allocation8 + $0xf8] sm:$0xff]  }
 0x156   :  { %1097 = vmatprep.subr.bf16.mxu0 %v1985_v12  ;;  %1179 = vmatprep.subr.bf16.mxu1 %v1988_v17  ;;  %v2049_v11 = vld [vmem:[#allocation8 + $0x38] sm:$0xff]  }
 0x157   :  { %v2050_v12 = vld [vmem:[#allocation8 + $0xb8] sm:$0xff]  }
 0x158   :  { %v374_v17 = vld [vmem:[%s2333_s4] sm:$0xf] }
 0x159   :  { %1098 = vmatpush1.bf16.msra.mxu0 %v1983_v19  ;;  %1180 = vmatpush1.bf16.msra.mxu1 %v1986_v20  ;;  %v379_v19 = vrot.slane %v374_v17, %v94_v14  ;;  %v387_v20 = vrot.slane %v374_v17, %v102_v30 }
 0x15a   :  { %1099 = vmatprep.subr.bf16.mxu0 %v1991_v21  ;;  %1181 = vmatprep.subr.bf16.mxu1 %v1994_v22  ;;  %v383_v21 = vrot.slane %v374_v17, %v98_v16  ;;  %v391_v22 = vrot.slane %v374_v17, %v106_v18 }
 0x15d   :  { %1100 = vmatpush1.bf16.msra.mxu0 %v1989_v23  ;;  %1182 = vmatpush1.bf16.msra.mxu1 %v1992_v24 }
 0x15e   :  { %1101 = vmatprep.subr.bf16.mxu0 %v1997_v25  ;;  %1183 = vmatprep.subr.bf16.mxu1 %v2000_v26 }
 0x161   :  { %1102 = vmatpush1.bf16.msra.mxu0 %v1995_v27  ;;  %1184 = vmatpush1.bf16.msra.mxu1 %v1998_v29 }
 0x162   :  { %1103 = vmatprep.subr.bf16.mxu0 %v2003_v31  ;;  %1185 = vmatprep.subr.bf16.mxu1 %v2006_v32 }
 0x165   :  { %1104 = vmatpush1.bf16.msra.mxu0 %v2001_v33  ;;  %1186 = vmatpush1.bf16.msra.mxu1 %v2004_v34 }
 0x166   :  { %1105 = vmatprep.subr.bf16.mxu0 %v2009_v36  ;;  %1187 = vmatprep.subr.bf16.mxu1 %v2012_v37 }
 0x169   :  { %1106 = vmatpush1.bf16.msra.mxu0 %v2007_v38  ;;  %1188 = vmatpush1.bf16.msra.mxu1 %v2010_v39 }
 0x16a   :  { %1107 = vmatprep.subr.bf16.mxu0 %v2015_v41  ;;  %1189 = vmatprep.subr.bf16.mxu1 %v2018_v42  ;;  %v1716_v42 = vld [vmem:[%s2335_s6] ss:$0 sm:$0xff]  ;;  %s2182_s6 = smov [#allocation10]  }
 0x16b   :  { %s1567_s29 = sshll.u32 %s2182_s6, 4  ;;  %s1568_s29 = int_to_ptr.vmem [resolvable:$true] %s1567_s29 }
 0x16c   :  { %s2143_s30 = scalar_lea.vmem %s1568_s29, 128  ;;  %p2148_p5 = scmp.lt.s32.totalorder %s1568_s29, %s1568_s29 }
 0x16d   :  { %1108 = vmatpush1.bf16.msra.mxu0 %v2013_v43  ;;  %1190 = vmatpush1.bf16.msra.mxu1 %v2016_v44  ;;  %p2144_p4 = scmp.ne.s32.totalorder %s1568_s29, %s2143_s30  ;;  %p2149_p6 = scmp.lt.s32.totalorder %s2143_s30, %s2143_s30 }
 0x16e   :  { %1749 = vmatprep.subr.bf16.mxu0 %v2019_v15  ;;  %1771 = vmatprep.subr.bf16.mxu1 %v2020_v46 }
 0x16f   :  { %p2150_p7 = por %p2149_p6, %p2148_p5 }
 0x170   :  { %1110 = vmatmul.mubr.bf16.vlgmr.msra.gmra.mrb[4].mxu0 %v244_v49  ;;  %1192 = vmatmul.mubr.bf16.vlgmr.msra.gmra.mrb[4].mxu1 %v244_v49 }
 0x171   :  { %1750 = vmatpush3.bf16.msra.mxu0 %v2021_v47  ;;  %1772 = vmatpush3.bf16.msra.mxu1 %v2022_v48  ;;  %p2151_p8 = pnand %p2150_p7, %p2144_p4 }
 0x172   :  { %1751 = vmatprep.subr.bf16.mxu0 %v2023_v28  ;;  %1773 = vmatprep.subr.bf16.mxu1 %v2024_v50 }
 0x175   :  { %1752 = vmatpush3.bf16.msra.mxu0 %v2025_v51  ;;  %1774 = vmatpush3.bf16.msra.mxu1 %v2026_v52 }
 0x176   :  { %1753 = vmatprep.subr.bf16.mxu0 %v2027_v53  ;;  %1775 = vmatprep.subr.bf16.mxu1 %v2028_v54 }
 0x179   :  { %1754 = vmatpush3.bf16.msra.mxu0 %v2029_v55  ;;  %1776 = vmatpush3.bf16.msra.mxu1 %v2030_v56 }
 0x17a   :  { %1755 = vmatprep.subr.bf16.mxu0 %v2031_v57  ;;  %1777 = vmatprep.subr.bf16.mxu1 %v2032_v58 }
 0x17d   :  { %1756 = vmatpush3.bf16.msra.mxu0 %v2033_v59  ;;  %1778 = vmatpush3.bf16.msra.mxu1 %v2034_v60 }
 0x17e   :  { %1757 = vmatprep.subr.bf16.mxu0 %v2035_v61  ;;  %1779 = vmatprep.subr.bf16.mxu1 %v2036_v62 }
 0x181   :  { %1758 = vmatpush3.bf16.msra.mxu0 %v2037_v63  ;;  %1780 = vmatpush3.bf16.msra.mxu1 %v2038_v0 }
 0x182   :  { %1759 = vmatprep.subr.bf16.mxu0 %v2039_v1  ;;  %1781 = vmatprep.subr.bf16.mxu1 %v2040_v2 }
 0x185   :  { %1760 = vmatpush3.bf16.msra.mxu0 %v2041_v3  ;;  %1782 = vmatpush3.bf16.msra.mxu1 %v2042_v4 }
 0x186   :  { %1761 = vmatprep.subr.bf16.mxu0 %v2043_v5  ;;  %1783 = vmatprep.subr.bf16.mxu1 %v2044_v6 }
 0x189   :  { %1762 = vmatpush3.bf16.msra.mxu0 %v2045_v7  ;;  %1784 = vmatpush3.bf16.msra.mxu1 %v2046_v8 }
 0x18a   :  { %1763 = vmatprep.subr.bf16.mxu0 %v2047_v9  ;;  %1785 = vmatprep.subr.bf16.mxu1 %v2048_v10 }
 0x18d   :  { %1764 = vmatpush3.bf16.msra.mxu0 %v2049_v11  ;;  %1786 = vmatpush3.bf16.msra.mxu1 %v2050_v12 }
 0x243   :  { %v1111_v23 = vpop.f32.mrb[4].mxu0  ;;  %v1193_v24 = vpop.f32.mrb[4].mxu1 }
 0x244   :  { %v1793_v25 = vadd.f32 %v1111_v23, %v379_v19  ;;  %v1795_v26 = vadd.f32 %v1193_v24, %v387_v20  ;;  %v1113_v27 = vpop.f32.mrb[5].mxu0  ;;  %v1195_v29 = vpop.f32.mrb[5].mxu1 }
 0x245   :  { %v1794_v31 = vadd.f32 %v1113_v27, %v383_v21  ;;  %v1796_v32 = vadd.f32 %v1195_v29, %v391_v22  ;;  %v1115_v33 = vpop.f32.mrb[6].mxu0  ;;  %v1197_v34 = vpop.f32.mrb[6].mxu1 }
 0x246   :  { %v1200_v14 = vmax.f32 %v1793_v25, 0.0  ;;  %v1202_v35 = vmax.f32 %v1795_v26, 0.0  ;;  %v1116_v36 = vpop.f32.mrb[7].mxu0  ;;  %v1198_v30 = vpop.f32.mrb[7].mxu1 }
 0x247   :  { %v1201_v37 = vmax.f32 %v1794_v31, 0.0  ;;  %v1203_v38 = vmax.f32 %v1796_v32, 0.0 }
 0x248   :  { %v1204_v13 = vpack.c.bf16 %v1200_v14, %v1200_v14  ;;  %v1206_v18 = vpack.c.bf16 %v1202_v35, %v1202_v35 }
 0x249   :  { %v1205_v16 = vpack.c.bf16 %v1201_v37, %v1201_v37  ;;  %v1207_v39 = vpack.c.bf16 %v1203_v38, %v1203_v38 }
 0x24b   :  { %1503 = vmatprep.mubr.bf16.mxu0 %v1205_v16  ;;  %1543 = vmatprep.mubr.bf16.mxu1 %v1207_v39 }
 0x24c   :  { %1504 = vmatmul.mubr.bf16.vlgmr.msra.gmra.mrb[8].mxu0 %v1204_v13  ;;  %1544 = vmatmul.mubr.bf16.vlgmr.msra.gmra.mrb[8].mxu1 %v1206_v18 }
 0x31f   :  { %v1765_v40 = vpop.f32.mrb[8].mxu0  ;;  %v1787_v41 = vpop.f32.mrb[8].mxu1 }
 0x320   :  { %v1766_v43 = vpop.f32.mrb[9].mxu0  ;;  %v1788_v44 = vpop.f32.mrb[9].mxu1 }
 0x321   :  { %v1767_v45 = vadd.f32 %v1766_v43, %v1765_v40  ;;  %v1789_v15 = vadd.f32 %v1788_v44, %v1787_v41  ;;  %v1768_v46 = vpop.f32.mrb[10].mxu0  ;;  %v1790_v47 = vpop.f32.mrb[10].mxu1 }
 0x322   :  { %v1769_v48 = vpop.f32.mrb[11].mxu0  ;;  %v1791_v49 = vpop.f32.mrb[11].mxu1 }
 0x323   :  { %v1506_v28 = vadd.f32 %v1767_v45, %v1716_v42 }
 0x325   :  { %v1546_v50 = vadd.f32 %v1789_v15, %v1506_v28 }
 0x327   :  { %1551 = vmax.xlane.f32.xlu0 %v1546_v50 }
 0x3b4   :  { %v1552_v51 = vpop.xlane.xlu0 %1551 }
 0x3b5   :  { %v1553_v52 = vsub.f32 %v1546_v50, %v1552_v51 }
 0x3b7   :  { %v1554_v53 = vmul.f32 1.442695, %v1553_v52 }
 0x3b9   :  { %2051 = vpow2.f32 %v1554_v53 }
 0x3c3   :  { %v2052_v54 = vpop.eup %2051 }
 0x3c4   :  { %1556 = vadd.xlane.f32.xlu0 %v2052_v54 }
 0x451   :  { %v1557_v55 = vpop.xlane.xlu0 %1556 }
 0x452   :  { %2053 = vrcp.f32 %v1557_v55 }
 0x45c   :  { %v2054_v56 = vpop.eup %2053 }
 0x45d   :  { %v1559_v57 = vmul.f32 %v2054_v56, %v2052_v54 }
 0x45f   :  { %1560 = vst [vmem:[#allocation10] sm:$0xff] %v1559_v57 }
 0x460   :  { %2154 = shalt.err (!%p2151_p8)
}
 0x461   :  { %s2155_s10 = scalar_lea.hbm %s2336_s7, 128 }
 0x462   :  { %p2156_p9 = scmp.ne.s32.totalorder %s2336_s7, %s2155_s10  ;;  %p2159_p10 = scmp.lt.u32.totalorder %s2155_s10, %s2336_s7 }
 0x464   :  { %p2161_p11 = pnand %p2159_p10, %p2156_p9 }
 0x466   :  { %2164 = shalt.err (!%p2161_p11)
}
 0x467   :  { %1570 = dma.vmem_to_hbm [thread:$0]  %s1568_s29, 128, %s2336_s7, [#allocation4]  }
 0x468   :  { %2171 = dma.done.wait [#allocation4], 128  }
 0x469   :  { %2172 = vsyncadd [#allocation4], 4294967168 }
 0x46a   :  { %1574 = vsyncpa [#allocation3], 1 }
 0x46b   :  { %1575 = vsyncpa [#allocation6], 1 }
 0x46c   :  { %1576 = vsyncpa [#allocation9], 1 }
 0x46d   :  { %1577 = vsyncpa [#allocation4], 1 }

</bundles_post_ra>
